<compile_context>
chip_gen: v7x
topology: tpu7x:2x2x1
jax: 0.10.0
libtpu: 0.0.40
codegen_flags: <defaults>
</compile_context>

<pallas_src>
import functools

import jax
import jax.numpy as jnp
from jax.experimental import pallas as pl
from jax.experimental.pallas import tpu as pltpu


def _round_up(x, m):
    return (x + m - 1) // m * m


def _fm_kernel(idx_ref, val_ref, wlin_t_ref, bias_ref, emb_t_ref, out_ref):
    # idx_ref    : (F, TB) int32   feature ids          (batch on lanes)
    # val_ref    : (F, TB) float32 feature values       (batch on lanes)
    # wlin_t_ref : (O, V)  float32 linear table, transposed (VMEM-resident)
    # bias_ref   : (O, 1)  float32
    # emb_t_ref  : (D, V)  float32 embedding table, transposed (VMEM-resident)
    # out_ref    : (O, TB) float32
    F, TB = val_ref.shape
    V = emb_t_ref.shape[1]

    idx = idx_ref[...]                                     # (F, TB)
    val = val_ref[...]                                     # (F, TB)

    # One-hot scatter-accumulate (fused gather): A[v,b], A2[v,b].
    vid = jax.lax.broadcasted_iota(jnp.int32, (V, TB), 0)  # (V, TB)
    hit = idx[None, :, :] == vid[:, None, :]               # (V, F, TB)
    val3 = val[None, :, :]                                 # (1, F, TB)
    A = jnp.sum(jnp.where(hit, val3, 0.0), axis=1)         # (V, TB)
    A2 = jnp.sum(jnp.where(hit, val3 * val3, 0.0), axis=1) # (V, TB)

    emb_t = emb_t_ref[...]                                 # (D, V)

    # FeatureLinear:  sum_f value * W[idx]                 -> (O, TB)
    linear = jnp.dot(wlin_t_ref[...], A, preferred_element_type=jnp.float32)
    # sum over fields of e = value * E[idx]                -> (D, TB)
    s = jnp.dot(emb_t, A, preferred_element_type=jnp.float32)
    # sum over fields of e^2                               -> (D, TB)
    sos = jnp.dot(emb_t * emb_t, A2, preferred_element_type=jnp.float32)
    # PairwiseInteraction: 0.5 * sum_d (square_of_sum - sum_of_square)
    pairwise = 0.5 * jnp.sum(s * s - sos, axis=0, keepdims=True)  # (1, TB)

    out_ref[...] = (linear + bias_ref[...] + pairwise).astype(out_ref.dtype)


@functools.partial(jax.jit, static_argnames=("tile_b",))
def fm_forward(feature_idx, feature_value, w_lin, bias, embedding, *, tile_b=512):
    """
    feature_idx:   (B, F) int32
    feature_value: (B, F) float32
    w_lin:         (num_features, O) float32
    bias:          (O,) float32
    embedding:     (num_features, D) float32
    returns:       (B, O) float32
    """
    B, F = feature_idx.shape
    V, O = w_lin.shape
    D = embedding.shape[1]

    # Lane-dense batch tiling: TILE_B is a multiple of 128, batch padded.
    tile_b = min(tile_b, _round_up(B, 128))
    b_pad = _round_up(B, tile_b)
    n_tiles = b_pad // tile_b

    # Batch-on-lanes layout; padded rows use idx=0 / value=0 (zero contribution).
    idx_t = jnp.pad(feature_idx.T.astype(jnp.int32), ((0, 0), (0, b_pad - B)))
    val_t = jnp.pad(feature_value.T.astype(jnp.float32), ((0, 0), (0, b_pad - B)))
    wlin_t = w_lin.astype(jnp.float32).T            # (O, V)
    emb_t = embedding.astype(jnp.float32).T         # (D, V)
    bias2d = bias.astype(jnp.float32).reshape(O, 1)

    out_t = pl.pallas_call(
        _fm_kernel,
        out_shape=jax.ShapeDtypeStruct((O, b_pad), jnp.float32),
        grid=(n_tiles,),
        in_specs=[
            pl.BlockSpec((F, tile_b), lambda i: (0, i)),   # feature ids
            pl.BlockSpec((F, tile_b), lambda i: (0, i)),   # feature values
            pl.BlockSpec((O, V), lambda i: (0, 0)),        # linear table (resident)
            pl.BlockSpec((O, 1), lambda i: (0, 0)),        # bias (resident)
            pl.BlockSpec((D, V), lambda i: (0, 0)),        # embedding table (resident)
        ],
        out_specs=pl.BlockSpec((O, tile_b), lambda i: (0, i)),
        compiler_params=pltpu.CompilerParams(
            dimension_semantics=("parallel",),
            vmem_limit_bytes=48 * 1024 * 1024,
        ),
    )(idx_t, val_t, wlin_t, bias2d, emb_t)

    return out_t.T[:B]                                     # (B, O)


def fm_reference(feature_idx, feature_value, w_lin, bias, embedding):
    wl = jnp.take(w_lin, feature_idx, axis=0)
    emb = jnp.take(embedding, feature_idx, axis=0)
    linear = jnp.sum(wl * feature_value[..., None], axis=1) + bias[None, :]
    e = emb * feature_value[..., None]
    s = jnp.sum(e, axis=1)
    pairwise = 0.5 * jnp.sum(s * s - jnp.sum(e * e, axis=1),
                             axis=-1, keepdims=True)
    return linear + pairwise


if __name__ == "__main__":
    num_features = 32     # vocabulary size of the feature index space
    num_fields = 8        # fields per example
    embedding_dim = 16
    out_features = 1
    batch = 2

    key = jax.random.PRNGKey(0)
    k_idx, k_val, k_wl, k_b, k_emb = jax.random.split(key, 5)

    feature_idx = jax.random.randint(
        k_idx, (batch, num_fields), 0, num_features, dtype=jnp.int32)
    feature_value = jax.random.uniform(
        k_val, (batch, num_fields), dtype=jnp.float32)

    w_lin = 0.01 * jax.random.normal(
        k_wl, (num_features, out_features), dtype=jnp.float32)
    bias = 0.01 * jax.random.normal(k_b, (out_features,), dtype=jnp.float32)
    embedding = 0.01 * jax.random.normal(
        k_emb, (num_features, embedding_dim), dtype=jnp.float32)

    out = fm_forward(feature_idx, feature_value, w_lin, bias, embedding)
    out = jax.block_until_ready(out)

    ref = fm_reference(feature_idx, feature_value, w_lin, bias, embedding)
    assert out.shape == (batch, out_features), out.shape
    assert jnp.allclose(out, ref, atol=1e-5, rtol=1e-5), (out, ref)

    print("KERNEL_OK")
</pallas_src>

<mosaic_0001>
module attributes {stable_mosaic.version = 11 : i64} {
  func.func @_fm_kernel(%arg0: i32, %arg1: memref<8x128xi32, #tpu.memory_space<vmem>>, %arg2: memref<8x128xf32, #tpu.memory_space<vmem>>, %arg3: memref<1x32xf32, #tpu.memory_space<vmem>>, %arg4: memref<1x1xf32, #tpu.memory_space<vmem>>, %arg5: memref<16x32xf32, #tpu.memory_space<vmem>>, %arg6: memref<1x128xf32, #tpu.memory_space<vmem>>) attributes {dimension_semantics = [#tpu.dimension_semantics<parallel>], iteration_bounds = array<i64: 1>, scalar_prefetch = 0 : i64, scratch_operands = 0 : i64, tpu.core_type = #tpu.core_type<tc>, window_params = [{transform_indices = @transform_0, window_bounds = array<i64: 8, 128>}, {transform_indices = @transform_1, window_bounds = array<i64: 8, 128>}, {pipeline_mode = #tpu.pipeline_mode<synchronous>, transform_indices = @transform_2, window_bounds = array<i64: 1, 32>}, {pipeline_mode = #tpu.pipeline_mode<synchronous>, transform_indices = @transform_3, window_bounds = array<i64: 1, 1>}, {pipeline_mode = #tpu.pipeline_mode<synchronous>, transform_indices = @transform_4, window_bounds = array<i64: 16, 32>}, {transform_indices = @transform_5, window_bounds = array<i64: 1, 128>}]} {
    %c0 = arith.constant 0 : index
    %c0_0 = arith.constant 0 : index
    %0 = vector.load %arg1[%c0, %c0_0] : memref<8x128xi32, #tpu.memory_space<vmem>>, vector<8x128xi32>
    %c0_1 = arith.constant 0 : index
    %c0_2 = arith.constant 0 : index
    %1 = vector.load %arg2[%c0_1, %c0_2] : memref<8x128xf32, #tpu.memory_space<vmem>>, vector<8x128xf32>
    %2 = tpu.iota {dimensions = array<i32: 0>} : vector<32x128xi32>
    %3 = vector.shape_cast %0 : vector<8x128xi32> to vector<1x8x128xi32>
    %4 = vector.shape_cast %2 : vector<32x128xi32> to vector<32x1x128xi32>
    %5 = vector.broadcast %3 : vector<1x8x128xi32> to vector<32x8x128xi32>
    %6 = vector.broadcast %4 : vector<32x1x128xi32> to vector<32x8x128xi32>
    %7 = arith.cmpi eq, %5, %6 : vector<32x8x128xi32>
    %8 = vector.shape_cast %1 : vector<8x128xf32> to vector<1x8x128xf32>
    %cst = arith.constant 0.000000e+00 : f32
    %9 = vector.shape_cast %8 : vector<1x8x128xf32> to vector<1x8x128xf32>
    %10 = vector.broadcast %9 : vector<1x8x128xf32> to vector<32x8x128xf32>
    %11 = vector.broadcast %cst : f32 to vector<32x8x128xf32>
    %12 = arith.select %7, %10, %11 : vector<32x8x128xi1>, vector<32x8x128xf32>
    %cst_3 = arith.constant dense<0.000000e+00> : vector<32x128xf32>
    %13 = vector.multi_reduction <add>, %12, %cst_3 [1] : vector<32x8x128xf32> to vector<32x128xf32>
    %14 = arith.mulf %8, %8 : vector<1x8x128xf32>
    %cst_4 = arith.constant 0.000000e+00 : f32
    %15 = vector.shape_cast %14 : vector<1x8x128xf32> to vector<1x8x128xf32>
    %16 = vector.broadcast %15 : vector<1x8x128xf32> to vector<32x8x128xf32>
    %17 = vector.broadcast %cst_4 : f32 to vector<32x8x128xf32>
    %18 = arith.select %7, %16, %17 : vector<32x8x128xi1>, vector<32x8x128xf32>
    %cst_5 = arith.constant dense<0.000000e+00> : vector<32x128xf32>
    %19 = vector.multi_reduction <add>, %18, %cst_5 [1] : vector<32x8x128xf32> to vector<32x128xf32>
    %c0_6 = arith.constant 0 : index
    %c0_7 = arith.constant 0 : index
    %20 = vector.load %arg5[%c0_6, %c0_7] : memref<16x32xf32, #tpu.memory_space<vmem>>, vector<16x32xf32>
    %c0_8 = arith.constant 0 : index
    %c0_9 = arith.constant 0 : index
    %21 = vector.load %arg3[%c0_8, %c0_9] : memref<1x32xf32, #tpu.memory_space<vmem>>, vector<1x32xf32>
    %cst_10 = arith.constant dense<0.000000e+00> : vector<1x128xf32>
    %22 = tpu.matmul %21, %13, %cst_10 {dimension_numbers = #tpu.dot_dimension_numbers<[1], [0], [0], [1], [0, 0, 1, 1], [], []>} : vector<1x32xf32>, vector<32x128xf32>, vector<1x128xf32> -> vector<1x128xf32>
    %cst_11 = arith.constant dense<0.000000e+00> : vector<16x128xf32>
    %23 = tpu.matmul %20, %13, %cst_11 {dimension_numbers = #tpu.dot_dimension_numbers<[1], [0], [0], [1], [0, 0, 1, 1], [], []>} : vector<16x32xf32>, vector<32x128xf32>, vector<16x128xf32> -> vector<16x128xf32>
    %24 = arith.mulf %20, %20 : vector<16x32xf32>
    %cst_12 = arith.constant dense<0.000000e+00> : vector<16x128xf32>
    %25 = tpu.matmul %24, %19, %cst_12 {dimension_numbers = #tpu.dot_dimension_numbers<[1], [0], [0], [1], [0, 0, 1, 1], [], []>} : vector<16x32xf32>, vector<32x128xf32>, vector<16x128xf32> -> vector<16x128xf32>
    %26 = arith.mulf %23, %23 : vector<16x128xf32>
    %27 = arith.subf %26, %25 : vector<16x128xf32>
    %cst_13 = arith.constant dense<0.000000e+00> : vector<128xf32>
    %28 = vector.multi_reduction <add>, %27, %cst_13 [0] : vector<16x128xf32> to vector<128xf32>
    %29 = vector.shape_cast %28 : vector<128xf32> to vector<1x128xf32>
    %cst_14 = arith.constant 5.000000e-01 : f32
    %30 = vector.broadcast %cst_14 : f32 to vector<1x128xf32>
    %31 = arith.mulf %30, %29 : vector<1x128xf32>
    %c0_15 = arith.constant 0 : index
    %c0_16 = arith.constant 0 : index
    %32 = vector.load %arg4[%c0_15, %c0_16] : memref<1x1xf32, #tpu.memory_space<vmem>>, vector<1x1xf32>
    %33 = vector.broadcast %32 : vector<1x1xf32> to vector<1x128xf32>
    %34 = arith.addf %22, %33 : vector<1x128xf32>
    %35 = arith.addf %34, %31 : vector<1x128xf32>
    %c0_17 = arith.constant 0 : index
    %c0_18 = arith.constant 0 : index
    %36 = vector.load %arg6[%c0_17, %c0_18] : memref<1x128xf32, #tpu.memory_space<vmem>>, vector<1x128xf32>
    tpu.vector_store %arg6[%c0_17, %c0_18], %35 {strides = array<i32>} : memref<1x128xf32, #tpu.memory_space<vmem>>, vector<1x128xf32>,
    return
  }
  func.func @transform_0(%arg0: i32) -> (i32, i32) {
    %c0_i32 = arith.constant 0 : i32
    %c0_i32_0 = arith.constant 0 : i32
    return %c0_i32, %arg0 : i32, i32
  }
  func.func @transform_1(%arg0: i32) -> (i32, i32) {
    %c0_i32 = arith.constant 0 : i32
    %c0_i32_0 = arith.constant 0 : i32
    return %c0_i32, %arg0 : i32, i32
  }
  func.func @transform_2(%arg0: i32) -> (i32, i32) {
    %c0_i32 = arith.constant 0 : i32
    %c0_i32_0 = arith.constant 0 : i32
    %c0_i32_1 = arith.constant 0 : i32
    return %c0_i32, %c0_i32_0 : i32, i32
  }
  func.func @transform_3(%arg0: i32) -> (i32, i32) {
    %c0_i32 = arith.constant 0 : i32
    %c0_i32_0 = arith.constant 0 : i32
    %c0_i32_1 = arith.constant 0 : i32
    return %c0_i32, %c0_i32_0 : i32, i32
  }
  func.func @transform_4(%arg0: i32) -> (i32, i32) {
    %c0_i32 = arith.constant 0 : i32
    %c0_i32_0 = arith.constant 0 : i32
    %c0_i32_1 = arith.constant 0 : i32
    return %c0_i32, %c0_i32_0 : i32, i32
  }
  func.func @transform_5(%arg0: i32) -> (i32, i32) {
    %c0_i32 = arith.constant 0 : i32
    %c0_i32_0 = arith.constant 0 : i32
    return %c0_i32, %arg0 : i32, i32
  }
}

</mosaic_0001>

<bundles_post_ra>
// kernel: fm_forward.1
= control target key start
LH: loop header
LB: loop body
LE: loop exit
PB: predicated region body
PF: predicated region fallthrough
CT: control target
= control target key end

     0   :  { %v24_v0 = vlaneseq  ;;  %v1920_v40 = vmov 0  ;;  %v1922_v41 = vmov 0  ;;  %v1924_v42 = vmov 0  ;;  %s1864_s1 = inlined_call_operand.vmem [shape: f32[8,128], index: 1, kind: input, shape index: {}]   ;;  %s1865_s0 = inlined_call_operand.vmem [shape: s32[8,128], index: 0, kind: input, shape index: {}]   ;;  %s1866_s4 = inlined_call_operand.vmem [shape: f32[16,32], index: 4, kind: input, shape index: {}]   ;;  %s1867_s3 = inlined_call_operand.<no memory space> [shape: f32[1,1], index: 3, kind: input, shape index: {}]   ;;  %s1868_s2 = inlined_call_operand.vmem [shape: f32[1,32], index: 2, kind: input, shape index: {}]   ;;  %s1869_s5 = inlined_call_operand.vmem [shape: f32[1,128], index: 5, kind: output, shape index: {}]  }
   0x1   :  { %v1163_v2 = vld [vmem:[%s1864_s1] sm:$0xff]  ;;  %v1926_v43 = vmov 0  ;;  %v1928_v44 = vmov 0  ;;  %v1930_v55 = vmov 0 }
   0x2   :  { %v1158_v1 = vshrl.u32 %v24_v0, 7  ;;  %v1194_v13 = vmul.f32 %v1163_v2, %v1163_v2  ;;  %v1199_v14 = vld [vmem:[%s1865_s0] sm:$0xff] }
   0x3   :  { %1899 = vst [vmem:[#allocation8_spill] sm:$0xff] %v1199_v14 }
   0x4   :  { %v26_v3 = vadd.s32 8, %v1158_v1  ;;  %v1167_v4 = vsub.s32 0, %v1158_v1  ;;  %v1170_v5 = vsub.s32 1, %v1158_v1  ;;  %v1173_v6 = vsub.s32 2, %v1158_v1 }
   0x5   :  { %v1176_v7 = vsub.s32 3, %v1158_v1  ;;  %v1179_v8 = vsub.s32 4, %v1158_v1  ;;  %v1182_v9 = vsub.s32 5, %v1158_v1  ;;  %v1185_v10 = vsub.s32 6, %v1158_v1 }
   0x6   :  { %v32_v11 = vrot.slane %v1158_v1, %v1167_v4  ;;  %v1190_v12 = vsub.s32 7, %v1158_v1  ;;  %v36_v15 = vrot.slane %v1158_v1, %v1170_v5  ;;  %v40_v16 = vrot.slane %v1158_v1, %v1173_v6 }
   0x7   :  { %1894 = vst [vmem:[#allocation3_spill] sm:$0xff] %v1176_v7  ;;  %1895 = vst [vmem:[#allocation4_spill] sm:$0xff] %v1179_v8  ;;  %v44_v17 = vrot.slane %v1158_v1, %v1176_v7  ;;  %v48_v18 = vrot.slane %v1158_v1, %v1179_v8  ;;  %v52_v19 = vrot.slane %v1158_v1, %v1182_v9 }
   0x8   :  { %1896 = vst [vmem:[#allocation5_spill] sm:$0xff] %v1182_v9  ;;  %1897 = vst [vmem:[#allocation6_spill] sm:$0xff] %v1185_v10  ;;  %v56_v20 = vrot.slane %v1158_v1, %v1185_v10  ;;  %v60_v21 = vrot.slane %v1158_v1, %v1190_v12  ;;  %v64_v22 = vrot.slane %v26_v3, %v1167_v4 }
   0x9   :  { %1898 = vst [vmem:[#allocation7_spill] sm:$0xff] %v1190_v12  ;;  %v68_v23 = vrot.slane %v26_v3, %v1170_v5  ;;  %v72_v24 = vrot.slane %v26_v3, %v1173_v6  ;;  %v76_v25 = vrot.slane %v26_v3, %v1176_v7  ;;  %v80_v26 = vrot.slane %v26_v3, %v1179_v8 }
   0xa   :  { %v84_v27 = vrot.slane %v26_v3, %v1182_v9  ;;  %v88_v28 = vrot.slane %v26_v3, %v1185_v10  ;;  %v92_v29 = vrot.slane %v26_v3, %v1190_v12  ;;  %vm1224_vm0 = vcmp.eq.s32.totalorder %v1199_v14, %v32_v11 }
   0xb   :  { %vm1229_vm1 = vcmp.eq.s32.totalorder %v1199_v14, %v36_v15  ;;  %vm1234_vm2 = vcmp.eq.s32.totalorder %v1199_v14, %v40_v16  ;;  %vm1239_vm3 = vcmp.eq.s32.totalorder %v1199_v14, %v44_v17  ;;  %vm1244_vm4 = vcmp.eq.s32.totalorder %v1199_v14, %v48_v18 }
   0xc   :  { %vm1249_vm5 = vcmp.eq.s32.totalorder %v1199_v14, %v52_v19  ;;  %vm1254_vm6 = vcmp.eq.s32.totalorder %v1199_v14, %v56_v20  ;;  %vm1259_vm7 = vcmp.eq.s32.totalorder %v1199_v14, %v60_v21  ;;  %vm1264_vm8 = vcmp.eq.s32.totalorder %v1199_v14, %v64_v22 }
   0xd   :  { %vm1269_vm9 = vcmp.eq.s32.totalorder %v1199_v14, %v68_v23  ;;  %vm1274_vm10 = vcmp.eq.s32.totalorder %v1199_v14, %v72_v24  ;;  %vm1279_vm11 = vcmp.eq.s32.totalorder %v1199_v14, %v76_v25  ;;  %vm1284_vm12 = vcmp.eq.s32.totalorder %v1199_v14, %v80_v26 }
   0xe   :  { %v1921_v40 = vsel %vm1274_vm10, 4294967295, %v1920_v40  ;;  %v1923_v41 = vsel %vm1279_vm11, 4294967295, %v1922_v41  ;;  %v1925_v42 = vsel %vm1284_vm12, 4294967295, %v1924_v42  ;;  %vm1289_vm13 = vcmp.eq.s32.totalorder %v1199_v14, %v84_v27 }
   0xf   :  { %v1927_v43 = vsel %vm1289_vm13, 4294967295, %v1926_v43  ;;  %vm1294_vm14 = vcmp.eq.s32.totalorder %v1199_v14, %v88_v28  ;;  %v189_v45 = vsel %vm1224_vm0, %v1163_v2, 0.0  ;;  %v190_v46 = vsel %vm1229_vm1, %v1163_v2, 0.0 }
  0x10   :  { %v1929_v44 = vsel %vm1294_vm14, 4294967295, %v1928_v44  ;;  %v191_v47 = vsel %vm1234_vm2, %v1163_v2, 0.0  ;;  %v192_v48 = vsel %vm1239_vm3, %v1163_v2, 0.0  ;;  %v193_v49 = vsel %vm1244_vm4, %v1163_v2, 0.0 }
  0x11   :  { %v194_v50 = vsel %vm1249_vm5, %v1163_v2, 0.0  ;;  %v195_v51 = vsel %vm1254_vm6, %v1163_v2, 0.0  ;;  %v196_v52 = vsel %vm1259_vm7, %v1163_v2, 0.0  ;;  %v1325_v53 = vsel %vm1264_vm8, %v1163_v2, 0.0 }
  0x12   :  { %v1330_v54 = vsel %vm1269_vm9, %v1163_v2, 0.0  ;;  %vm1333_vm15 = vcmp.eq.s32.totalorder %v1199_v14, %v92_v29  ;;  %v1340_v56 = vsel %vm1274_vm10, %v1163_v2, 0.0  ;;  %v1345_v57 = vsel %vm1279_vm11, %v1163_v2, 0.0 }
  0x13   :  { %v1931_v55 = vsel %vm1333_vm15, 4294967295, %v1930_v55  ;;  %v1350_v58 = vsel %vm1284_vm12, %v1163_v2, 0.0  ;;  %v1355_v59 = vsel %vm1289_vm13, %v1163_v2, 0.0  ;;  %v1360_v60 = vsel %vm1294_vm14, %v1163_v2, 0.0 }
  0x14   :  { %v221_v61 = vrot.slane %v189_v45, 4  ;;  %v227_v62 = vrot.slane %v190_v46, 4  ;;  %v233_v63 = vrot.slane %v191_v47, 4  ;;  %v239_v0 = vrot.slane %v192_v48, 4 }
  0x15   :  { %v245_v3 = vrot.slane %v193_v49, 4  ;;  %v251_v11 = vrot.slane %v194_v50, 4  ;;  %v257_v15 = vrot.slane %v195_v51, 4  ;;  %v263_v19 = vrot.slane %v196_v52, 4 }
  0x16   :  { %v222_v16 = vadd.f32 %v221_v61, %v189_v45  ;;  %v228_v17 = vadd.f32 %v227_v62, %v190_v46  ;;  %v234_v18 = vadd.f32 %v233_v63, %v191_v47  ;;  %v240_v20 = vadd.f32 %v239_v0, %v192_v48 }
  0x17   :  { %v246_v21 = vadd.f32 %v245_v3, %v193_v49  ;;  %v252_v22 = vadd.f32 %v251_v11, %v194_v50  ;;  %v258_v23 = vadd.f32 %v257_v15, %v195_v51  ;;  %v264_v27 = vadd.f32 %v263_v19, %v196_v52 }
  0x18   :  { %v223_v24 = vrot.slane %v222_v16, 2  ;;  %v229_v25 = vrot.slane %v228_v17, 2  ;;  %v235_v26 = vrot.slane %v234_v18, 2  ;;  %v241_v28 = vrot.slane %v240_v20, 2 }
  0x19   :  { %v247_v29 = vrot.slane %v246_v21, 2  ;;  %v253_v14 = vrot.slane %v252_v22, 2  ;;  %v259_v12 = vrot.slane %v258_v23, 2  ;;  %v265_v7 = vrot.slane %v264_v27, 2 }
  0x1a   :  { %v224_v10 = vadd.f32 %v223_v24, %v222_v16  ;;  %v230_v9 = vadd.f32 %v229_v25, %v228_v17  ;;  %v236_v8 = vadd.f32 %v235_v26, %v234_v18  ;;  %v242_v45 = vadd.f32 %v241_v28, %v240_v20 }
  0x1b   :  { %v248_v46 = vadd.f32 %v247_v29, %v246_v21  ;;  %v254_v47 = vadd.f32 %v253_v14, %v252_v22  ;;  %v260_v61 = vadd.f32 %v259_v12, %v258_v23  ;;  %v1362_v51 = vadd.f32 %v265_v7, %v264_v27 }
  0x1c   :  { %v225_v48 = vrot.slane %v224_v10, 1  ;;  %v231_v49 = vrot.slane %v230_v9, 1  ;;  %v237_v50 = vrot.slane %v236_v8, 1  ;;  %v243_v62 = vrot.slane %v242_v45, 1 }
  0x1d   :  { %v249_v63 = vrot.slane %v248_v46, 1  ;;  %v255_v52 = vrot.slane %v254_v47, 1  ;;  %v261_v0 = vrot.slane %v260_v61, 1  ;;  %v204_v3 = vsel %vm1333_vm15, %v1163_v2, 0.0 }
  0x1e   :  { %v1367_v11 = vadd.f32 %v225_v48, %v224_v10  ;;  %v1369_v15 = vadd.f32 %v231_v49, %v230_v9  ;;  %v1371_v16 = vadd.f32 %v237_v50, %v236_v8  ;;  %v1373_v12 = vadd.f32 %v243_v62, %v242_v45 }
  0x1f   :  { %v1375_v14 = vadd.f32 %v249_v63, %v248_v46  ;;  %v1377_v7 = vadd.f32 %v255_v52, %v254_v47  ;;  %v267_v17 = vrot.slane %v1362_v51, 1  ;;  %v1380_v18 = vadd.f32 %v261_v0, %v260_v61 }
  0x20   :  { %v269_v19 = vrot.slane %v1325_v53, 4  ;;  %v275_v20 = vrot.slane %v1330_v54, 4  ;;  %v281_v10 = vrot.slane %v1340_v56, 4  ;;  %v287_v9 = vrot.slane %v1345_v57, 4 }
  0x21   :  { %v293_v8 = vrot.slane %v1350_v58, 4  ;;  %v299_v21 = vrot.slane %v1355_v59, 4  ;;  %v305_v22 = vrot.slane %v1360_v60, 4  ;;  %v311_v26 = vrot.slane %v204_v3, 4 }
  0x22   :  { %v270_v23 = vadd.f32 %v269_v19, %v1325_v53  ;;  %v276_v24 = vadd.f32 %v275_v20, %v1330_v54  ;;  %v282_v25 = vadd.f32 %v281_v10, %v1340_v56  ;;  %v288_v27 = vadd.f32 %v287_v9, %v1345_v57 }
  0x23   :  { %v294_v28 = vadd.f32 %v293_v8, %v1350_v58  ;;  %v300_v29 = vadd.f32 %v299_v21, %v1355_v59  ;;  %v306_v45 = vadd.f32 %v305_v22, %v1360_v60  ;;  %v312_v48 = vadd.f32 %v311_v26, %v204_v3 }
  0x24   :  { %v271_v46 = vrot.slane %v270_v23, 2  ;;  %v277_v47 = vrot.slane %v276_v24, 2  ;;  %v283_v61 = vrot.slane %v282_v25, 2  ;;  %v289_v53 = vrot.slane %v288_v27, 2 }
  0x25   :  { %v295_v54 = vrot.slane %v294_v28, 2  ;;  %v301_v49 = vrot.slane %v300_v29, 2  ;;  %v307_v56 = vrot.slane %v306_v45, 2  ;;  %v313_v63 = vrot.slane %v312_v48, 2 }
  0x26   :  { %v272_v50 = vadd.f32 %v271_v46, %v270_v23  ;;  %v278_v62 = vadd.f32 %v277_v47, %v276_v24  ;;  %v284_v57 = vadd.f32 %v283_v61, %v282_v25  ;;  %v290_v58 = vadd.f32 %v289_v53, %v288_v27 }
  0x27   :  { %v296_v59 = vadd.f32 %v295_v54, %v294_v28  ;;  %v302_v52 = vadd.f32 %v301_v49, %v300_v29  ;;  %v308_v60 = vadd.f32 %v307_v56, %v306_v45  ;;  %v314_v3 = vadd.f32 %v313_v63, %v312_v48 }
  0x28   :  { %v273_v0 = vrot.slane %v272_v50, 1  ;;  %v279_v19 = vrot.slane %v278_v62, 1  ;;  %v285_v20 = vrot.slane %v284_v57, 1  ;;  %v291_v10 = vrot.slane %v290_v58, 1 }
  0x29   :  { %v297_v9 = vrot.slane %v296_v59, 1  ;;  %v303_v8 = vrot.slane %v302_v52, 1  ;;  %v309_v21 = vrot.slane %v308_v60, 1  ;;  %v315_v24 = vrot.slane %v314_v3, 1 }
  0x2a   :  { %v274_v22 = vadd.f32 %v273_v0, %v272_v50  ;;  %v280_v26 = vadd.f32 %v279_v19, %v278_v62  ;;  %v286_v23 = vadd.f32 %v285_v20, %v284_v57  ;;  %v268_v25 = vadd.f32 %v267_v17, %v1362_v51 }
  0x2b   :  { %v292_v46 = vadd.f32 %v291_v10, %v290_v58  ;;  %v298_v27 = vadd.f32 %v297_v9, %v296_v59  ;;  %v304_v28 = vadd.f32 %v303_v8, %v302_v52  ;;  %v310_v29 = vadd.f32 %v309_v21, %v308_v60 }
  0x2c   :  { %v316_v45 = vadd.f32 %v315_v24, %v314_v3  ;;  %vm1932_vm13 = vcmask 1041409   ;;  %vm1934_vm12 = vcmask 1042434   ;;  %v414_v51 = vsel %vm1224_vm0, %v1194_v13, 0.0 }
  0x2d   :  { %v674_v47 = vsel %vm1932_vm13, %v1369_v15, %v1367_v11  ;;  %vm1933_vm14 = vmmov %vm1932_vm13  ;;  %v415_v17 = vsel %vm1229_vm1, %v1194_v13, 0.0  ;;  %vm1936_vm11 = vcmask 1043459   ;;  %v416_v15 = vsel %vm1234_vm2, %v1194_v13, 0.0 }
  0x2e   :  { %v687_v61 = vsel %vm1933_vm14, %v280_v26, %v274_v22  ;;  %v676_v48 = vsel %vm1934_vm12, %v1371_v16, %v674_v47  ;;  %vm1935_vm15 = vmmov %vm1934_vm12  ;;  %v417_v16 = vsel %vm1239_vm3, %v1194_v13, 0.0  ;;  %vm1938_vm12 = vcmask 1044484  }
  0x2f   :  { %v688_v53 = vsel %vm1935_vm15, %v286_v23, %v687_v61  ;;  %v678_v54 = vsel %vm1936_vm11, %v1373_v12, %v676_v48  ;;  %vm1937_vm10 = vmmov %vm1936_vm11  ;;  %v418_v31 = vsel %vm1244_vm4, %v1194_v13, 0.0  ;;  %v419_v12 = vsel %vm1249_vm5, %v1194_v13, 0.0 }
  0x30   :  { %v689_v11 = vsel %vm1937_vm10, %v292_v46, %v688_v53  ;;  %v680_v30 = vsel %vm1938_vm12, %v1375_v14, %v678_v54  ;;  %vm1939_vm0 = vmmov %vm1938_vm12  ;;  %vm1940_vm1 = vcmask 1045509   ;;  %v420_v33 = vsel %vm1254_vm6, %v1194_v13, 0.0 }
  0x31   :  { %v690_v49 = vsel %vm1939_vm0, %v298_v27, %v689_v11  ;;  %v682_v32 = vsel %vm1940_vm1, %v1377_v7, %v680_v30  ;;  %vm1941_vm2 = vmmov %vm1940_vm1  ;;  %v421_v14 = vsel %vm1259_vm7, %v1194_v13, 0.0  ;;  %vm1942_vm3 = vcmask 1046534  }
  0x32   :  { %v691_v56 = vsel %vm1941_vm2, %v304_v28, %v690_v49  ;;  %v684_v34 = vsel %vm1942_vm3, %v1380_v18, %v682_v32  ;;  %vm1943_vm4 = vmmov %vm1942_vm3  ;;  %v1443_v35 = vsel %vm1264_vm8, %v1194_v13, 0.0  ;;  %v1448_v7 = vsel %vm1269_vm9, %v1194_v13, 0.0 }
  0x33   :  { %v692_v50 = vsel %vm1943_vm4, %v310_v29, %v691_v56  ;;  %vm1944_vm5 = vcmask 1047559   ;;  %vm1946_vm7 = vnez %v1921_v40  ;;  %vm1947_vm10 = vnez %v1923_v41  ;;  %vm1952_vm15 = vmmov %vm1933_vm14 }
  0x34   :  { %v686_v36 = vsel %vm1944_vm5, %v268_v25, %v684_v34  ;;  %vm1945_vm6 = vmmov %vm1944_vm5  ;;  %v1455_v18 = vsel %vm1946_vm7, %v1194_v13, 0.0  ;;  %v1460_v38 = vsel %vm1947_vm10, %v1194_v13, 0.0  ;;  %vm1948_vm8 = vnez %v1925_v42 }
  0x35   :  { %v693_v37 = vsel %vm1945_vm6, %v316_v45, %v692_v50  ;;  %v1467_v39 = vsel %vm1948_vm8, %v1194_v13, 0.0  ;;  %vm1949_vm9 = vnez %v1927_v43  ;;  %vm1950_vm11 = vnez %v1929_v44 }
  0x36   :  { %v1462_v62 = vpack.c.bf16 %v693_v37, %v686_v36  ;;  %v1472_v57 = vsel %vm1949_vm9, %v1194_v13, 0.0  ;;  %v1477_v40 = vsel %vm1950_vm11, %v1194_v13, 0.0  ;;  %v446_v41 = vrot.slane %v414_v51, 4 }
  0x37   :  { %v452_v63 = vrot.slane %v415_v17, 4  ;;  %v458_v58 = vrot.slane %v416_v15, 4  ;;  %v464_v59 = vrot.slane %v417_v16, 4  ;;  %v470_v52 = vrot.slane %v418_v31, 4 }
  0x38   :  { %1098 = vmatprep.subr.bf16.mxu0 %v1462_v62  ;;  %v476_v42 = vrot.slane %v419_v12, 4  ;;  %v482_v60 = vrot.slane %v420_v33, 4  ;;  %v488_v0 = vrot.slane %v421_v14, 4  ;;  %v447_v43 = vadd.f32 %v446_v41, %v414_v51 }
  0x39   :  { %1100 = vmatpush3.bf16.msra.mxu0 %v1462_v62  ;;  %v453_v19 = vadd.f32 %v452_v63, %v415_v17  ;;  %v459_v20 = vadd.f32 %v458_v58, %v416_v15  ;;  %v465_v3 = vadd.f32 %v464_v59, %v417_v16  ;;  %v471_v10 = vadd.f32 %v470_v52, %v418_v31 }
  0x3a   :  { %v477_v44 = vadd.f32 %v476_v42, %v419_v12  ;;  %v483_v9 = vadd.f32 %v482_v60, %v420_v33  ;;  %v489_v8 = vadd.f32 %v488_v0, %v421_v14  ;;  %v448_v21 = vrot.slane %v447_v43, 2 }
  0x3b   :  { %v454_v22 = vrot.slane %v453_v19, 2  ;;  %v460_v26 = vrot.slane %v459_v20, 2  ;;  %v466_v23 = vrot.slane %v465_v3, 2  ;;  %v472_v24 = vrot.slane %v471_v10, 2 }
  0x3c   :  { %v478_v25 = vrot.slane %v477_v44, 2  ;;  %v484_v46 = vrot.slane %v483_v9, 2  ;;  %v490_v27 = vrot.slane %v489_v8, 2  ;;  %v449_v28 = vadd.f32 %v448_v21, %v447_v43 }
  0x3d   :  { %v455_v29 = vadd.f32 %v454_v22, %v453_v19  ;;  %v461_v45 = vadd.f32 %v460_v26, %v459_v20  ;;  %v467_v47 = vadd.f32 %v466_v23, %v465_v3  ;;  %v473_v61 = vadd.f32 %v472_v24, %v471_v10 }
  0x3e   :  { %v479_v48 = vadd.f32 %v478_v25, %v477_v44  ;;  %v485_v53 = vadd.f32 %v484_v46, %v483_v9  ;;  %v491_v51 = vadd.f32 %v490_v27, %v489_v8  ;;  %v450_v17 = vrot.slane %v449_v28, 1 }
  0x3f   :  { %v456_v54 = vrot.slane %v455_v29, 1  ;;  %v462_v11 = vrot.slane %v461_v45, 1  ;;  %v468_v15 = vrot.slane %v467_v47, 1  ;;  %vm1951_vm13 = vnez %v1931_v55 }
  0x40   :  { %v429_v16 = vsel %vm1951_vm13, %v1194_v13, 0.0  ;;  %v474_v30 = vrot.slane %v473_v61, 1  ;;  %v480_v49 = vrot.slane %v479_v48, 1  ;;  %v486_v31 = vrot.slane %v485_v53, 1 }
  0x41   :  { %v451_v12 = vadd.f32 %v450_v17, %v449_v28  ;;  %v457_v32 = vadd.f32 %v456_v54, %v455_v29  ;;  %v463_v56 = vadd.f32 %v462_v11, %v461_v45  ;;  %v492_v33 = vrot.slane %v491_v51, 1 }
  0x42   :  { %v1484_v14 = vadd.f32 %v468_v15, %v467_v47  ;;  %v1486_v34 = vadd.f32 %v474_v30, %v473_v61  ;;  %v1488_v50 = vadd.f32 %v480_v49, %v479_v48  ;;  %v1490_v36 = vadd.f32 %v486_v31, %v485_v53 }
  0x43   :  { %v494_v37 = vrot.slane %v1443_v35, 4  ;;  %v500_v55 = vrot.slane %v1448_v7, 4  ;;  %v506_v41 = vrot.slane %v1455_v18, 4  ;;  %v512_v63 = vrot.slane %v1460_v38, 4 }
  0x44   :  { %v518_v58 = vrot.slane %v1467_v39, 4  ;;  %v524_v59 = vrot.slane %v1472_v57, 4  ;;  %v530_v52 = vrot.slane %v1477_v40, 4  ;;  %v536_v42 = vrot.slane %v429_v16, 4 }
  0x45   :  { %v495_v60 = vadd.f32 %v494_v37, %v1443_v35  ;;  %v501_v0 = vadd.f32 %v500_v55, %v1448_v7  ;;  %v507_v43 = vadd.f32 %v506_v41, %v1455_v18  ;;  %v513_v19 = vadd.f32 %v512_v63, %v1460_v38  ;;  %v1509_v37 = vld [vmem:[%s1866_s4] sm:$0xff] }
  0x46   :  { %v519_v20 = vadd.f32 %v518_v58, %v1467_v39  ;;  %v525_v3 = vadd.f32 %v524_v59, %v1472_v57  ;;  %v531_v10 = vadd.f32 %v530_v52, %v1477_v40  ;;  %v537_v44 = vadd.f32 %v536_v42, %v429_v16 }
  0x47   :  { %v496_v9 = vrot.slane %v495_v60, 2  ;;  %v502_v8 = vrot.slane %v501_v0, 2  ;;  %v508_v21 = vrot.slane %v507_v43, 2  ;;  %v514_v22 = vrot.slane %v513_v19, 2 }
  0x48   :  { %v520_v26 = vrot.slane %v519_v20, 2  ;;  %v526_v23 = vrot.slane %v525_v3, 2  ;;  %v532_v35 = vrot.slane %v531_v10, 2  ;;  %v538_v24 = vrot.slane %v537_v44, 2 }
  0x49   :  { %v497_v7 = vadd.f32 %v496_v9, %v495_v60  ;;  %v503_v25 = vadd.f32 %v502_v8, %v501_v0  ;;  %v509_v18 = vadd.f32 %v508_v21, %v507_v43  ;;  %v515_v46 = vadd.f32 %v514_v22, %v513_v19  ;;  %v1959_v0 = vld [vmem:[#allocation3_spill] sm:$0xff]  ;;  %v1966_v8 = vld [vmem:[#allocation6_spill] sm:$0xff] }
  0x4a   :  { %v521_v38 = vadd.f32 %v520_v26, %v519_v20  ;;  %v527_v27 = vadd.f32 %v526_v23, %v525_v3  ;;  %v533_v39 = vadd.f32 %v532_v35, %v531_v10  ;;  %v539_v28 = vadd.f32 %v538_v24, %v537_v44  ;;  %v1962_v20 = vld [vmem:[#allocation4_spill] sm:$0xff]  ;;  %v1963_v10 = vld [vmem:[#allocation5_spill] sm:$0xff]  ;;  %v1967_v22 = vld [vmem:[#allocation7_spill] sm:$0xff] }
  0x4b   :  { %v498_v57 = vrot.slane %v497_v7, 1  ;;  %v504_v29 = vrot.slane %v503_v25, 1  ;;  %v510_v40 = vrot.slane %v509_v18, 1  ;;  %v516_v45 = vrot.slane %v515_v46, 1 }
  0x4c   :  { %v522_v47 = vrot.slane %v521_v38, 1  ;;  %v528_v61 = vrot.slane %v527_v27, 1  ;;  %v534_v48 = vrot.slane %v533_v39, 1  ;;  %v540_v53 = vrot.slane %v539_v28, 1 }
  0x4d   :  { %v499_v17 = vadd.f32 %v498_v57, %v497_v7  ;;  %v505_v54 = vadd.f32 %v504_v29, %v503_v25  ;;  %v511_v11 = vadd.f32 %v510_v40, %v509_v18  ;;  %v517_v15 = vadd.f32 %v516_v45, %v515_v46 }
  0x4e   :  { %v493_v16 = vadd.f32 %v492_v33, %v491_v51  ;;  %v523_v30 = vadd.f32 %v522_v47, %v521_v38  ;;  %v529_v49 = vadd.f32 %v528_v61, %v527_v27  ;;  %v535_v31 = vadd.f32 %v534_v48, %v533_v39  ;;  %v1970_v39 = vld [vmem:[#allocation8_spill] sm:$0xff] }
  0x4f   :  { %v541_v55 = vadd.f32 %v540_v53, %v539_v28  ;;  %v828_v41 = vsel %vm1933_vm14, %v457_v32, %v451_v12  ;;  %v835_v63 = vsel %vm1952_vm15, %v505_v54, %v499_v17  ;;  %v27_v58 = vadd.s32 16, %v1158_v1 }
  0x50   :  { %vm1953_vm12 = vcmask 1042434   ;;  %v28_v51 = vadd.s32 24, %v1158_v1  ;;  %vm1888_vm1 = vcmask 261120   ;;  %vm1955_vm2 = vcmask 1043459  }
  0x51   :  { %v829_v59 = vsel %vm1953_vm12, %v463_v56, %v828_v41  ;;  %vm1954_vm0 = vmmov %vm1953_vm12  ;;  %v96_v60 = vrot.slane %v27_v58, %v1167_v4  ;;  %v100_v12 = vrot.slane %v27_v58, %v1170_v5  ;;  %1072 = vmatprep.mubr.msk.f32.mxu0 %vm1888_vm1, %v1509_v37  ;;  %vm1957_vm4 = vcmask 1044484  }
  0x52   :  { %v836_v52 = vsel %vm1954_vm0, %v511_v11, %v835_v63  ;;  %v830_v33 = vsel %vm1955_vm2, %v1484_v14, %v829_v59  ;;  %vm1956_vm3 = vmmov %vm1955_vm2  ;;  %v104_v1 = vrot.slane %v27_v58, %v1173_v6  ;;  %v108_v43 = vrot.slane %v27_v58, %v1959_v0 }
  0x53   :  { %v837_v42 = vsel %vm1956_vm3, %v517_v15, %v836_v52  ;;  %v831_v32 = vsel %vm1957_vm4, %v1486_v34, %v830_v33  ;;  %vm1958_vm5 = vmmov %vm1957_vm4  ;;  %vm1960_vm6 = vcmask 1045509   ;;  %v112_v3 = vrot.slane %v27_v58, %v1962_v20 }
  0x54   :  { %v838_v56 = vsel %vm1958_vm5, %v523_v30, %v837_v42  ;;  %v832_v14 = vsel %vm1960_vm6, %v1488_v50, %v831_v32  ;;  %vm1961_vm7 = vmmov %vm1960_vm6  ;;  %v116_v44 = vrot.slane %v27_v58, %v1963_v10  ;;  %vm1964_vm10 = vcmask 1046534  }
  0x55   :  { %v839_v19 = vsel %vm1961_vm7, %v529_v49, %v838_v56  ;;  %v833_v9 = vsel %vm1964_vm10, %v1490_v36, %v832_v14  ;;  %vm1965_vm8 = vmmov %vm1964_vm10  ;;  %v120_v21 = vrot.slane %v27_v58, %v1966_v8  ;;  %v124_v26 = vrot.slane %v27_v58, %v1967_v22 }
  0x56   :  { %v840_v34 = vsel %vm1965_vm8, %v535_v31, %v839_v19  ;;  %vm1968_vm9 = vcmask 1047559   ;;  %v128_v50 = vrot.slane %v28_v51, %v1167_v4  ;;  %v132_v24 = vrot.slane %v28_v51, %v1170_v5 }
  0x57   :  { %v834_v23 = vsel %vm1968_vm9, %v493_v16, %v833_v9  ;;  %vm1969_vm11 = vmmov %vm1968_vm9  ;;  %v136_v25 = vrot.slane %v28_v51, %v1173_v6  ;;  %v140_v18 = vrot.slane %v28_v51, %v1959_v0  ;;  %v144_v36 = vrot.slane %v28_v51, %v1962_v20 }
  0x58   :  { %v841_v35 = vsel %vm1969_vm11, %v541_v55, %v840_v34  ;;  %v148_v46 = vrot.slane %v28_v51, %v1963_v10  ;;  %v152_v38 = vrot.slane %v28_v51, %v1966_v8  ;;  %v156_v27 = vrot.slane %v28_v51, %v1967_v22 }
  0x59   :  { %v1105_v7 = vpack.c.bf16 %v841_v35, %v834_v23  ;;  %vm1550_vm13 = vcmp.eq.s32.totalorder %v1970_v39, %v96_v60  ;;  %vm1555_vm14 = vcmp.eq.s32.totalorder %v1970_v39, %v100_v12  ;;  %vm1560_vm15 = vcmp.eq.s32.totalorder %v1970_v39, %v104_v1 }
  0x5a   :  { %vm1565_vm12 = vcmp.eq.s32.totalorder %v1970_v39, %v108_v43  ;;  %vm1570_vm0 = vcmp.eq.s32.totalorder %v1970_v39, %v112_v3  ;;  %vm1575_vm2 = vcmp.eq.s32.totalorder %v1970_v39, %v116_v44  ;;  %vm1580_vm3 = vcmp.eq.s32.totalorder %v1970_v39, %v120_v21 }
  0x5b   :  { %1106 = vmatprep.subr.bf16.mxu1 %v1105_v7  ;;  %vm1585_vm4 = vcmp.eq.s32.totalorder %v1970_v39, %v124_v26  ;;  %vm1590_vm5 = vcmp.eq.s32.totalorder %v1970_v39, %v128_v50  ;;  %vm1595_vm6 = vcmp.eq.s32.totalorder %v1970_v39, %v132_v24  ;;  %vm1600_vm7 = vcmp.eq.s32.totalorder %v1970_v39, %v136_v25 }
  0x5c   :  { %1108 = vmatpush3.bf16.msra.mxu1 %v1105_v7  ;;  %vm1605_vm10 = vcmp.eq.s32.totalorder %v1970_v39, %v140_v18  ;;  %v1993_v17 = vmov 0  ;;  %vm1610_vm8 = vcmp.eq.s32.totalorder %v1970_v39, %v144_v36  ;;  %v1995_v54 = vmov 0 }
  0x5d   :  { %v1994_v17 = vsel %vm1605_vm10, 4294967295, %v1993_v17  ;;  %v1996_v54 = vsel %vm1610_vm8, 4294967295, %v1995_v54  ;;  %vm1615_vm9 = vcmp.eq.s32.totalorder %v1970_v39, %v148_v46  ;;  %v1997_v11 = vmov 0 }
  0x5e   :  { %v1998_v11 = vsel %vm1615_vm9, 4294967295, %v1997_v11  ;;  %vm1620_vm11 = vcmp.eq.s32.totalorder %v1970_v39, %v152_v38  ;;  %v1999_v15 = vmov 0  ;;  %vm1625_vm1 = vcmp.eq.s32.totalorder %v1970_v39, %v156_v27 }
  0x5f   :  { %v2000_v15 = vsel %vm1620_vm11, 4294967295, %v1999_v15  ;;  %v2001_v16 = vmov 0  ;;  %v205_v30 = vsel %vm1550_vm13, %v1163_v2, 0.0  ;;  %v206_v49 = vsel %vm1555_vm14, %v1163_v2, 0.0 }
  0x60   :  { %v2002_v16 = vsel %vm1625_vm1, 4294967295, %v2001_v16  ;;  %v207_v31 = vsel %vm1560_vm15, %v1163_v2, 0.0  ;;  %v208_v55 = vsel %vm1565_vm12, %v1163_v2, 0.0  ;;  %v209_v41 = vsel %vm1570_vm0, %v1163_v2, 0.0 }
  0x61   :  { %v210_v63 = vsel %vm1575_vm2, %v1163_v2, 0.0  ;;  %v211_v58 = vsel %vm1580_vm3, %v1163_v2, 0.0  ;;  %v212_v59 = vsel %vm1585_vm4, %v1163_v2, 0.0  ;;  %v213_v52 = vsel %vm1590_vm5, %v1163_v2, 0.0 }
  0x62   :  { %v1659_v51 = vsel %vm1595_vm6, %v1163_v2, 0.0  ;;  %v1664_v33 = vsel %vm1600_vm7, %v1163_v2, 0.0  ;;  %v1669_v42 = vsel %vm1605_vm10, %v1163_v2, 0.0  ;;  %v1674_v60 = vsel %vm1610_vm8, %v1163_v2, 0.0 }
  0x63   :  { %v1679_v12 = vsel %vm1615_vm9, %v1163_v2, 0.0  ;;  %v1684_v32 = vsel %vm1620_vm11, %v1163_v2, 0.0  ;;  %v1689_v56 = vsel %vm1625_vm1, %v1163_v2, 0.0  ;;  %v317_v1 = vrot.slane %v205_v30, 4 }
  0x64   :  { %v323_v0 = vrot.slane %v206_v49, 4  ;;  %v329_v43 = vrot.slane %v207_v31, 4  ;;  %v335_v14 = vrot.slane %v208_v55, 4  ;;  %v341_v19 = vrot.slane %v209_v41, 4 }
  0x65   :  { %v318_v20 = vadd.f32 %v317_v1, %v205_v30  ;;  %v347_v3 = vrot.slane %v210_v63, 4  ;;  %v353_v10 = vrot.slane %v211_v58, 4  ;;  %v359_v44 = vrot.slane %v212_v59, 4 }
  0x66   :  { %v324_v9 = vadd.f32 %v323_v0, %v206_v49  ;;  %v330_v34 = vadd.f32 %v329_v43, %v207_v31  ;;  %v336_v8 = vadd.f32 %v335_v14, %v208_v55  ;;  %v342_v21 = vadd.f32 %v341_v19, %v209_v41 }
  0x67   :  { %v319_v22 = vrot.slane %v318_v20, 2  ;;  %v348_v26 = vadd.f32 %v347_v3, %v210_v63  ;;  %v354_v23 = vadd.f32 %v353_v10, %v211_v58  ;;  %v360_v35 = vadd.f32 %v359_v44, %v212_v59 }
  0x68   :  { %v325_v50 = vrot.slane %v324_v9, 2  ;;  %v331_v2 = vrot.slane %v330_v34, 2  ;;  %v337_v24 = vrot.slane %v336_v8, 2  ;;  %v343_v7 = vrot.slane %v342_v21, 2 }
  0x69   :  { %v320_v25 = vadd.f32 %v319_v22, %v318_v20  ;;  %v349_v18 = vrot.slane %v348_v26, 2  ;;  %v355_v36 = vrot.slane %v354_v23, 2  ;;  %v361_v46 = vrot.slane %v360_v35, 2 }
  0x6a   :  { %v326_v38 = vadd.f32 %v325_v50, %v324_v9  ;;  %v332_v27 = vadd.f32 %v331_v2, %v330_v34  ;;  %v338_v39 = vadd.f32 %v337_v24, %v336_v8  ;;  %v344_v30 = vadd.f32 %v343_v7, %v342_v21 }
  0x6b   :  { %v321_v49 = vrot.slane %v320_v25, 1  ;;  %v350_v31 = vadd.f32 %v349_v18, %v348_v26  ;;  %v356_v55 = vadd.f32 %v355_v36, %v354_v23  ;;  %v362_v41 = vadd.f32 %v361_v46, %v360_v35 }
  0x6c   :  { %v327_v1 = vrot.slane %v326_v38, 1  ;;  %v333_v63 = vrot.slane %v332_v27, 1  ;;  %v339_v58 = vrot.slane %v338_v39, 1  ;;  %v345_v59 = vrot.slane %v344_v30, 1 }
  0x6d   :  { %v322_v0 = vadd.f32 %v321_v49, %v320_v25  ;;  %v351_v43 = vrot.slane %v350_v31, 1  ;;  %v357_v14 = vrot.slane %v356_v55, 1  ;;  %v363_v19 = vrot.slane %v362_v41, 1 }
  0x6e   :  { %v328_v20 = vadd.f32 %v327_v1, %v326_v38  ;;  %v334_v3 = vadd.f32 %v333_v63, %v332_v27  ;;  %v340_v10 = vadd.f32 %v339_v58, %v338_v39  ;;  %v346_v44 = vadd.f32 %v345_v59, %v344_v30 }
  0x6f   :  { %v1691_v9 = vadd.f32 %v351_v43, %v350_v31  ;;  %v1693_v34 = vadd.f32 %v357_v14, %v356_v55  ;;  %v1695_v8 = vadd.f32 %v363_v19, %v362_v41  ;;  %v365_v21 = vrot.slane %v213_v52, 4 }
  0x70   :  { %v371_v22 = vrot.slane %v1659_v51, 4  ;;  %v377_v26 = vrot.slane %v1664_v33, 4  ;;  %v383_v23 = vrot.slane %v1669_v42, 4  ;;  %v389_v35 = vrot.slane %v1674_v60, 4 }
  0x71   :  { %v366_v50 = vadd.f32 %v365_v21, %v213_v52  ;;  %v395_v2 = vrot.slane %v1679_v12, 4  ;;  %v401_v24 = vrot.slane %v1684_v32, 4  ;;  %v407_v7 = vrot.slane %v1689_v56, 4 }
  0x72   :  { %v372_v25 = vadd.f32 %v371_v22, %v1659_v51  ;;  %v378_v18 = vadd.f32 %v377_v26, %v1664_v33  ;;  %v384_v36 = vadd.f32 %v383_v23, %v1669_v42  ;;  %v390_v46 = vadd.f32 %v389_v35, %v1674_v60 }
  0x73   :  { %v367_v38 = vrot.slane %v366_v50, 2  ;;  %v396_v27 = vadd.f32 %v395_v2, %v1679_v12  ;;  %v402_v39 = vadd.f32 %v401_v24, %v1684_v32  ;;  %v408_v52 = vadd.f32 %v407_v7, %v1689_v56 }
  0x74   :  { %v373_v30 = vrot.slane %v372_v25, 2  ;;  %v379_v49 = vrot.slane %v378_v18, 2  ;;  %v385_v31 = vrot.slane %v384_v36, 2  ;;  %v391_v55 = vrot.slane %v390_v46, 2 }
  0x75   :  { %v368_v41 = vadd.f32 %v367_v38, %v366_v50  ;;  %v397_v1 = vrot.slane %v396_v27, 2  ;;  %v403_v51 = vrot.slane %v402_v39, 2  ;;  %v409_v63 = vrot.slane %v408_v52, 2 }
  0x76   :  { %v374_v33 = vadd.f32 %v373_v30, %v372_v25  ;;  %v380_v58 = vadd.f32 %v379_v49, %v378_v18  ;;  %v386_v42 = vadd.f32 %v385_v31, %v384_v36  ;;  %v392_v59 = vadd.f32 %v391_v55, %v390_v46 }
  0x77   :  { %v369_v60 = vrot.slane %v368_v41, 1  ;;  %v398_v43 = vadd.f32 %v397_v1, %v396_v27  ;;  %v404_v14 = vadd.f32 %v403_v51, %v402_v39  ;;  %v410_v12 = vadd.f32 %v409_v63, %v408_v52 }
  0x78   :  { %v375_v19 = vrot.slane %v374_v33, 1  ;;  %v381_v32 = vrot.slane %v380_v58, 1  ;;  %v387_v21 = vrot.slane %v386_v42, 1  ;;  %v393_v56 = vrot.slane %v392_v59, 1 }
  0x79   :  { %v370_v22 = vadd.f32 %v369_v60, %v368_v41  ;;  %v399_v26 = vrot.slane %v398_v43, 1  ;;  %v405_v23 = vrot.slane %v404_v14, 1  ;;  %v411_v35 = vrot.slane %v410_v12, 1 }
  0x7a   :  { %v376_v50 = vadd.f32 %v375_v19, %v374_v33  ;;  %v382_v2 = vadd.f32 %v381_v32, %v380_v58  ;;  %v388_v24 = vadd.f32 %v387_v21, %v386_v42  ;;  %v394_v7 = vadd.f32 %v393_v56, %v392_v59 }
  0x7b   :  { %v400_v25 = vadd.f32 %v399_v26, %v398_v43  ;;  %v406_v18 = vadd.f32 %v405_v23, %v404_v14  ;;  %v412_v36 = vadd.f32 %v411_v35, %v410_v12  ;;  %vm2003_vm1 = vcmask 1041409  }
  0x7c   :  { %v694_v46 = vsel %vm2003_vm1, %v328_v20, %v322_v0  ;;  %vm2004_vm11 = vcmask 1042434   ;;  %vm2005_vm9 = vmmov %vm2003_vm1  ;;  %v430_v39 = vsel %vm1550_vm13, %v1194_v13, 0.0  ;;  %v431_v52 = vsel %vm1555_vm14, %v1194_v13, 0.0 }
  0x7d   :  { %v695_v38 = vsel %vm2004_vm11, %v334_v3, %v694_v46  ;;  %v701_v27 = vsel %vm2005_vm9, %v376_v50, %v370_v22  ;;  %vm2006_vm8 = vcmask 1043459   ;;  %vm2007_vm10 = vmmov %vm2004_vm11  ;;  %v432_v0 = vsel %vm1560_vm15, %v1194_v13, 0.0 }
  0x7e   :  { %v696_v30 = vsel %vm2006_vm8, %v340_v10, %v695_v38  ;;  %v702_v49 = vsel %vm2007_vm10, %v382_v2, %v701_v27  ;;  %v433_v20 = vsel %vm1565_vm12, %v1194_v13, 0.0  ;;  %vm2008_vm1 = vcmask 1044484   ;;  %vm2009_vm9 = vmmov %vm2006_vm8 }
  0x7f   :  { %v697_v3 = vsel %vm2008_vm1, %v346_v44, %v696_v30  ;;  %v703_v28 = vsel %vm2009_vm9, %v388_v24, %v702_v49  ;;  %v434_v5 = vsel %vm1570_vm0, %v1194_v13, 0.0  ;;  %v435_v10 = vsel %vm1575_vm2, %v1194_v13, 0.0  ;;  %vm2011_vm14 = vmmov %vm2008_vm1 }
  0x80   :  { %vm2010_vm13 = vcmask 1045509   ;;  %v704_v31 = vsel %vm2011_vm14, %v394_v7, %v703_v28  ;;  %v436_v57 = vsel %vm1580_vm3, %v1194_v13, 0.0  ;;  %v437_v44 = vsel %vm1585_vm4, %v1194_v13, 0.0 }
  0x81   :  { %v698_v6 = vsel %vm2010_vm13, %v1691_v9, %v697_v3  ;;  %vm2012_vm15 = vcmask 1046534   ;;  %vm2013_vm12 = vmmov %vm2010_vm13  ;;  %v1751_v40 = vsel %vm1590_vm5, %v1194_v13, 0.0  ;;  %v1756_v9 = vsel %vm1595_vm6, %v1194_v13, 0.0 }
  0x82   :  { %v699_v29 = vsel %vm2012_vm15, %v1693_v34, %v698_v6  ;;  %v705_v55 = vsel %vm2013_vm12, %v400_v25, %v704_v31  ;;  %vm2014_vm0 = vcmask 1047559   ;;  %vm2015_vm2 = vmmov %vm2012_vm15  ;;  %v1764_v34 = vsel %vm1600_vm7, %v1194_v13, 0.0 }
  0x83   :  { %v700_v45 = vsel %vm2014_vm0, %v1695_v8, %v699_v29  ;;  %v706_v47 = vsel %vm2015_vm2, %v406_v18, %v705_v55  ;;  %vm2016_vm3 = vnez %v1994_v17  ;;  %vm2017_vm4 = vmmov %vm2014_vm0  ;;  %vm2018_vm5 = vnez %v1996_v54 }
  0x84   :  { %v1769_v61 = vsel %vm2016_vm3, %v1194_v13, 0.0  ;;  %v707_v41 = vsel %vm2017_vm4, %v412_v36, %v706_v47  ;;  %v1775_v48 = vsel %vm2018_vm5, %v1194_v13, 0.0  ;;  %vm2019_vm6 = vnez %v1998_v11 }
  0x85   :  { %v1780_v8 = vsel %vm2019_vm6, %v1194_v13, 0.0  ;;  %vm2020_vm7 = vnez %v2000_v15  ;;  %v1787_v17 = vpack.c.bf16 %v707_v41, %v700_v45  ;;  %vm2021_vm10 = vnez %v2002_v16 }
  0x86   :  { %v1785_v53 = vsel %vm2020_vm7, %v1194_v13, 0.0  ;;  %v1792_v1 = vsel %vm2021_vm10, %v1194_v13, 0.0  ;;  %v542_v54 = vrot.slane %v430_v39, 4  ;;  %v548_v51 = vrot.slane %v431_v52, 4  ;;  %v1799_v13 = vld [vmem:[%s1866_s4 + $0x8] sm:$0xff] }
  0x87   :  { %v554_v63 = vrot.slane %v432_v0, 4  ;;  %v560_v33 = vrot.slane %v433_v20, 4  ;;  %v566_v58 = vrot.slane %v434_v5, 4  ;;  %v572_v11 = vrot.slane %v435_v10, 4  ;;  %1102 = vmatprep.subr.bf16.mxu0 %v1787_v17 }
  0x88   :  { %v543_v42 = vadd.f32 %v542_v54, %v430_v39  ;;  %v549_v59 = vadd.f32 %v548_v51, %v431_v52  ;;  %v578_v15 = vrot.slane %v436_v57, 4  ;;  %v584_v60 = vrot.slane %v437_v44, 4  ;;  %1104 = vmatpush3.bf16.msra.mxu0 %v1787_v17 }
  0x89   :  { %v555_v43 = vadd.f32 %v554_v63, %v432_v0  ;;  %v561_v14 = vadd.f32 %v560_v33, %v433_v20  ;;  %v567_v12 = vadd.f32 %v566_v58, %v434_v5  ;;  %v573_v16 = vadd.f32 %v572_v11, %v435_v10 }
  0x8a   :  { %v544_v19 = vrot.slane %v543_v42, 2  ;;  %v550_v32 = vrot.slane %v549_v59, 2  ;;  %v579_v21 = vadd.f32 %v578_v15, %v436_v57  ;;  %v585_v56 = vadd.f32 %v584_v60, %v437_v44 }
  0x8b   :  { %v556_v22 = vrot.slane %v555_v43, 2  ;;  %v562_v26 = vrot.slane %v561_v14, 2  ;;  %v568_v23 = vrot.slane %v567_v12, 2  ;;  %v574_v35 = vrot.slane %v573_v16, 2 }
  0x8c   :  { %v545_v50 = vadd.f32 %v544_v19, %v543_v42  ;;  %v551_v2 = vadd.f32 %v550_v32, %v549_v59  ;;  %v580_v24 = vrot.slane %v579_v21, 2  ;;  %v586_v7 = vrot.slane %v585_v56, 2 }
  0x8d   :  { %vm2022_vm8 = vcmask 261120   ;;  %v557_v25 = vadd.f32 %v556_v22, %v555_v43  ;;  %v563_v18 = vadd.f32 %v562_v26, %v561_v14  ;;  %v569_v36 = vadd.f32 %v568_v23, %v567_v12 }
  0x8e   :  { %1073 = vmatmul.mubr.msk.f32.vlgmr.msra.gmra.mrb[0].mxu0 %vm2022_vm8, %v1799_v13  ;;  %v575_v46 = vadd.f32 %v574_v35, %v573_v16  ;;  %v546_v38 = vrot.slane %v545_v50, 1  ;;  %v552_v27 = vrot.slane %v551_v2, 1  ;;  %v581_v39 = vadd.f32 %v580_v24, %v579_v21  ;;  %vm2031_vm2 = vmmov %vm2022_vm8 }
  0x8f   :  { %v587_v52 = vadd.f32 %v586_v7, %v585_v56  ;;  %v558_v30 = vrot.slane %v557_v25, 1  ;;  %v564_v49 = vrot.slane %v563_v18, 1  ;;  %v570_v0 = vrot.slane %v569_v36, 1 }
  0x90   :  { %v576_v20 = vrot.slane %v575_v46, 1  ;;  %v547_v3 = vadd.f32 %v546_v38, %v545_v50  ;;  %v553_v28 = vadd.f32 %v552_v27, %v551_v2  ;;  %v582_v5 = vrot.slane %v581_v39, 1 }
  0x91   :  { %v588_v10 = vrot.slane %v587_v52, 1  ;;  %v559_v6 = vadd.f32 %v558_v30, %v557_v25  ;;  %v565_v31 = vadd.f32 %v564_v49, %v563_v18  ;;  %v1803_v57 = vadd.f32 %v570_v0, %v569_v36 }
  0x92   :  { %v1805_v44 = vadd.f32 %v576_v20, %v575_v46  ;;  %v1807_v29 = vadd.f32 %v582_v5, %v581_v39  ;;  %v590_v45 = vrot.slane %v1751_v40, 4  ;;  %v596_v47 = vrot.slane %v1756_v9, 4 }
  0x93   :  { %v1809_v55 = vadd.f32 %v588_v10, %v587_v52  ;;  %v602_v41 = vrot.slane %v1764_v34, 4  ;;  %v608_v54 = vrot.slane %v1769_v61, 4  ;;  %v614_v51 = vrot.slane %v1775_v48, 4 }
  0x94   :  { %v620_v63 = vrot.slane %v1780_v8, 4  ;;  %v591_v33 = vadd.f32 %v590_v45, %v1751_v40  ;;  %v597_v58 = vadd.f32 %v596_v47, %v1756_v9  ;;  %v626_v11 = vrot.slane %v1785_v53, 4 }
  0x95   :  { %v632_v42 = vrot.slane %v1792_v1, 4  ;;  %v603_v59 = vadd.f32 %v602_v41, %v1764_v34  ;;  %v609_v15 = vadd.f32 %v608_v54, %v1769_v61  ;;  %v615_v60 = vadd.f32 %v614_v51, %v1775_v48 }
  0x96   :  { %v621_v43 = vadd.f32 %v620_v63, %v1780_v8  ;;  %v592_v14 = vrot.slane %v591_v33, 2  ;;  %v598_v12 = vrot.slane %v597_v58, 2  ;;  %v627_v16 = vadd.f32 %v626_v11, %v1785_v53 }
  0x97   :  { %v633_v40 = vadd.f32 %v632_v42, %v1792_v1  ;;  %v604_v19 = vrot.slane %v603_v59, 2  ;;  %v610_v9 = vrot.slane %v609_v15, 2  ;;  %v616_v32 = vrot.slane %v615_v60, 2  ;;  %v640_v42 = vld [vmem:[%s1868_s2] sm:$0x1] }
  0x98   :  { %v622_v21 = vrot.slane %v621_v43, 2  ;;  %v593_v56 = vadd.f32 %v592_v14, %v591_v33  ;;  %v599_v22 = vadd.f32 %v598_v12, %v597_v58  ;;  %v628_v26 = vrot.slane %v627_v16, 2 }
  0x99   :  { %v634_v34 = vrot.slane %v633_v40, 2  ;;  %v605_v23 = vadd.f32 %v604_v19, %v603_v59  ;;  %v611_v61 = vadd.f32 %v610_v9, %v609_v15  ;;  %v617_v35 = vadd.f32 %v616_v32, %v615_v60 }
  0x9a   :  { %v623_v48 = vadd.f32 %v622_v21, %v621_v43  ;;  %v594_v50 = vrot.slane %v593_v56, 1  ;;  %v600_v8 = vrot.slane %v599_v22, 1  ;;  %v629_v2 = vadd.f32 %v628_v26, %v627_v16 }
  0x9b   :  { %v635_v24 = vadd.f32 %v634_v34, %v633_v40  ;;  %v606_v7 = vrot.slane %v605_v23, 1  ;;  %v612_v53 = vrot.slane %v611_v61, 1  ;;  %v618_v25 = vrot.slane %v617_v35, 1 }
  0x9c   :  { %v624_v1 = vrot.slane %v623_v48, 1  ;;  %v595_v18 = vadd.f32 %v594_v50, %v593_v56  ;;  %v601_v36 = vadd.f32 %v600_v8, %v599_v22  ;;  %v630_v46 = vrot.slane %v629_v2, 1 }
  0x9d   :  { %v636_v38 = vrot.slane %v635_v24, 1  ;;  %v607_v27 = vadd.f32 %v606_v7, %v605_v23  ;;  %v613_v39 = vadd.f32 %v612_v53, %v611_v61  ;;  %v619_v52 = vadd.f32 %v618_v25, %v617_v35 }
  0x9e   :  { %v625_v30 = vadd.f32 %v624_v1, %v623_v48  ;;  %v631_v49 = vadd.f32 %v630_v46, %v629_v2  ;;  %vm2023_vm11 = vcmask 1041409   ;;  %vm2025_vm9 = vcmask 1042434  }
  0x9f   :  { %v637_v0 = vadd.f32 %v636_v38, %v635_v24  ;;  %v842_v20 = vsel %vm2023_vm11, %v553_v28, %v547_v3  ;;  %vm2024_vm1 = vmmov %vm2023_vm11  ;;  %v794_v47 = vmul.f32 %v1509_v37, %v1509_v37  ;;  %vm2027_vm14 = vcmask 1043459  }
  0xa0   :  { %v849_v5 = vsel %vm2024_vm1, %v601_v36, %v595_v18  ;;  %v843_v10 = vsel %vm2025_vm9, %v559_v6, %v842_v20  ;;  %vm2026_vm13 = vmmov %vm2025_vm9  ;;  %v1124_v51 = vmov 0.0|0.0   ;;  %vm2029_vm12 = vcmask 1044484  }
  0xa1   :  { %v850_v45 = vsel %vm2026_vm13, %v607_v27, %v849_v5  ;;  %v844_v41 = vsel %vm2027_vm14, %v565_v31, %v843_v10  ;;  %vm2028_vm15 = vmmov %vm2027_vm14  ;;  %1113 = vmatprep.subr.bf16.mxu0 %v1124_v51  ;;  %1083 = vmatprep.mubr.msk.f32.mxu1 %vm2031_vm2, %v794_v47  ;;  %v10_v28 = vstv %s1867_s3  ;;  %vm2032_vm3 = vcmask 1045509  }
  0xa2   :  { %v851_v54 = vsel %vm2028_vm15, %v613_v39, %v850_v45  ;;  %v845_v63 = vsel %vm2029_vm12, %v1803_v57, %v844_v41  ;;  %vm2030_vm0 = vmmov %vm2029_vm12  ;;  %1115 = vmatpush3.bf16.msra.mxu0 %v1462_v62  ;;  %vm1125_vm5 = vmmov 0   ;;  %v1126_v31 = vmov 0.0   ;;  %11 = vst [vmem:[#allocation2] sm:$0x1] %v10_v28 }
  0xa3   :  { %v852_v3 = vsel %vm2030_vm0, %v619_v52, %v851_v54  ;;  %v846_v37 = vsel %vm2032_vm3, %v1805_v44, %v845_v63  ;;  %vm2033_vm4 = vmmov %vm2032_vm3  ;;  %1116 = vmatprep.subr.bf16.mxu0 %v1124_v51  ;;  %1094 = vmatprep.mubr.msk.f32.mxu0 %vm1125_vm5, %v1126_v31  ;;  %vm2034_vm6 = vcmask 1046534   ;;  %v1127_v62 = vmov 0  }
  0xa4   :  { %v853_v6 = vsel %vm2033_vm4, %v625_v30, %v852_v3  ;;  %v847_v57 = vsel %vm2034_vm6, %v1807_v29, %v846_v37  ;;  %vm2035_vm7 = vmmov %vm2034_vm6  ;;  %1123 = vset.pattern.permute.xlu0 %v1127_v62  ;;  %vm2036_vm10 = vcmask 1047559   ;;  %v795_v29 = vmul.f32 %v1799_v13, %v1799_v13 }
  0xa5   :  { %v854_v33 = vsel %vm2035_vm7, %v631_v49, %v853_v6  ;;  %v848_v58 = vsel %vm2036_vm10, %v1809_v55, %v847_v57  ;;  %vm2037_vm8 = vmmov %vm2036_vm10 }
  0xa6   :  { %v855_v11 = vsel %vm2037_vm8, %v637_v0, %v854_v33  ;;  %1118 = vmatpush3.bf16.msra.mxu0 %v1787_v17  ;;  %vm2038_vm11 = vmmov %vm2031_vm2 }
  0xa7   :  { %v1109_v44 = vpack.c.bf16 %v855_v11, %v848_v58  ;;  %vm2039_vm1 = vmmov %vm2031_vm2 }
  0xa9   :  { %1110 = vmatprep.subr.bf16.mxu1 %v1109_v44  ;;  %1095 = vmatmul.mubr.msk.f32.vlgmr.msra.gmra.mrb[2].mxu0 %vm2038_vm11, %v640_v42  ;;  %v953_v59 = vld [vmem:[#allocation2] sm:$0x1] }
  0xaa   :  { %1112 = vmatpush3.bf16.msra.mxu1 %v1109_v44  ;;  %956 = vperm.xlu0 %1123, %v953_v59  }
  0xad   :  { %1084 = vmatmul.mubr.msk.f32.vlgmr.msra.gmra.mrb[0].mxu1 %vm2039_vm1, %v795_v29 }
 0x129   :  { %v957_v21 = vpop.permute.xlu0 %956 }
 0x12a   :  { %v962_v26 = vrot.slane %v957_v21, %v1167_v4 }
 0x161   :  { %v1074_v55 = vpop.f32.mrb[0].mxu0 }
 0x162   :  { %v785_v15 = vpop.f32.mrb[1].mxu0  ;;  %v942_v60 = vmul.f32 %v1074_v55, %v1074_v55 }
 0x163   :  { %v941_v17 = vmul.f32 %v785_v15, %v785_v15 }
 0x17c   :  { %v1032_v43 = vpop.f32.mrb[2].mxu0 }
 0x17d   :  { %v1096_v14 = vpop.f32.mrb[3].mxu0  ;;  %v1033_v61 = vadd.f32 %v1032_v43, %v962_v26 }
 0x180   :  { %v1085_v12 = vpop.f32.mrb[0].mxu1 }
 0x181   :  { %v944_v16 = vsub.f32 %v942_v60, %v1085_v12  ;;  %v932_v40 = vpop.f32.mrb[1].mxu1 }
 0x182   :  { %v943_v19 = vsub.f32 %v941_v17, %v932_v40 }
 0x184   :  { %v945_v9 = vadd.f32 %v944_v16, %v943_v19 }
 0x186   :  { %v946_v32 = vrot.slane %v945_v9, 4 }
 0x188   :  { %v947_v13 = vadd.f32 %v946_v32, %v945_v9 }
 0x18a   :  { %v948_v56 = vrot.slane %v947_v13, 2 }
 0x18c   :  { %v949_v22 = vadd.f32 %v948_v56, %v947_v13 }
 0x18e   :  { %v950_v34 = vrot.slane %v949_v22, 1 }
 0x190   :  { %v951_v23 = vadd.f32 %v950_v34, %v949_v22 }
 0x192   :  { %v952_v35 = vmul.f32 0.5, %v951_v23 }
 0x194   :  { %v1036_v48 = vadd.f32 %v1033_v61, %v952_v35 }
 0x196   :  { %1037 = vst [vmem:[%s1869_s5] sm:$0x1] %v1036_v48 }

</bundles_post_ra>
